<compile_context>
chip_gen: v7x
topology: tpu7x:2x2x1
jax: 0.10.0
libtpu: 0.0.40
codegen_flags: <defaults>
</compile_context>

<pallas_src>
import jax
import jax.numpy as jnp
from jax.experimental import pallas as pl
from jax.experimental.pallas import tpu as pltpu


# ----------------------------------------------------------------------------- kernel
def _add_bias_kernel(x_ref, b_ref, o_ref):
    # x_ref: (tb, td) activation tile; b_ref: (1, td) bias row (broadcast over rows).
    o_ref[...] = (x_ref[...] + b_ref[...]).astype(o_ref.dtype)


# ---------------------------------------------------------------- generation params
_DEFAULT_TILE_BYTES = 2 << 20     # per-block target when the chip is unknown
_DEFAULT_SMALL_BYTES = 256 << 10  # XLA-bypass threshold when the chip is unknown


def _tpu_generation_params():
    """Return (target_tile_bytes, small_bypass_bytes, n_tensorcores, vmem_limit_bytes|None)."""
    target, small, n_tc, vmem_limit = _DEFAULT_TILE_BYTES, _DEFAULT_SMALL_BYTES, 1, None
    try:
        kind = jax.devices()[0].device_kind.lower()
    except Exception:
        return target, small, n_tc, vmem_limit
    if "v7" in kind:
        # 64 MiB VMEM, ~3.2 TB/s, 2 TCs/chip: bigger blocks, higher bypass threshold.
        return 4 << 20, 1 << 20, 2, 48 << 20
    if "v6" in kind:
        # 128 MiB VMEM, ~1.4 TB/s, single TC.
        return 4 << 20, 256 << 10, 1, 64 << 20
    if "v5" in kind:
        if "lite" in kind or "v5e" in kind:
            return 2 << 20, 256 << 10, 1, 32 << 20      # v5e: single TC
        return 2 << 20, 256 << 10, 2, 32 << 20          # v5p: megacore (2 TCs)
    if "v4" in kind:
        return 2 << 20, 256 << 10, 2, None               # v4 megacore, default scoped VMEM
    return target, small, n_tc, vmem_limit


# ------------------------------------------------------------------------ tile picker
def _cdiv(a: int, b: int) -> int:
    return -(-a // b)


def _round_up(a: int, m: int) -> int:
    return _cdiv(a, m) * m


def _sublane_multiple(itemsize: int) -> int:
    # f32 -> 8, bf16 -> 16, int8/fp8 -> 32 (sub-32-bit dtypes pack along sublanes)
    return max(8, 32 // itemsize)


def _choose_tiles(B: int, D: int, itemsize: int, target_bytes: int, n_tc: int):
    sub = _sublane_multiple(itemsize)

    # Feature (lane) tile: keep the full row whenever a single sublane-strip of it
    # fits the budget.  Otherwise pick a LARGE 128-multiple that need not divide D;
    # the tail feature block is masked via pl.cdiv (keeps DMAs row-contiguous).
    if D % 128 == 0 and D * itemsize * sub > target_bytes:
        td = max(512, (target_bytes // (sub * itemsize)) // 128 * 128)
        td = min(td, D)
    else:
        td = D
    grid_j = _cdiv(D, td)

    # Batch (sublane) tile: as many rows as fit the per-block budget.
    rows = max(sub, (target_bytes // (td * itemsize)) // sub * sub)
    n_row_steps = _cdiv(B, rows)

    # Multi-TensorCore chips (v7x, v4/v5p megacore): make the total step count
    # reasonably large and divisible by the core count so both cores stay busy.
    # Single-TC chips (v5e/v6e): fewer steps is strictly better -> no forced split.
    if n_tc > 1:
        max_row_steps = _cdiv(B, sub)
        want = max(2 * n_tc, 8)
        while ((n_row_steps * grid_j < want or (n_row_steps * grid_j) % n_tc != 0)
               and n_row_steps < max_row_steps):
            n_row_steps += 1

    # Rebalance rows across steps so a ragged tail block is not nearly empty.
    tb = _round_up(_cdiv(B, n_row_steps), sub)
    if tb >= B:
        tb = B
    return tb, td


# --------------------------------------------------------------------------- wrapper
def add_bias(
    x: jax.Array,
    bias: jax.Array,
    *,
    tb: int | None = None,
    td: int | None = None,
    donate_x: bool = False,
    force_pallas: bool = False,
) -> jax.Array:
    """Pallas implementation of AddBias.forward: returns x + bias, with bias
    broadcast over all leading dims of x (matching the PyTorch module).

    Pass donate_x=True when x is dead after the add to alias the output onto x's
    buffer (halves peak HBM footprint)."""
    orig_shape = x.shape
    D = orig_shape[-1]
    assert bias.size == D, "bias must have x.shape[-1] elements"
    # TODO(synk): if bias.dtype is wider than x.dtype, PyTorch would promote the add;
    # we compute in x.dtype (the usual same-dtype parameter case).
    bias1d = bias.reshape(D).astype(x.dtype)

    B = 1
    for s in orig_shape[:-1]:
        B *= s
    if B == 0 or D == 0:
        return x

    x2 = x.reshape(B, D)
    itemsize = jnp.dtype(x.dtype).itemsize
    target_bytes, small_bytes, n_tc, vmem_limit = _tpu_generation_params()

    # Tiny / narrow-lane path: a standalone pallas_call is pure overhead here
    # (sub-128-lane masked stores + fixed launch cost). Threshold is generation-keyed.
    is_small = (D < 128) or (B * D * itemsize < small_bytes)
    if is_small and not force_pallas and tb is None and td is None:
        return (x2 + bias1d[None, :]).reshape(orig_shape)

    sub = _sublane_multiple(itemsize)
    if tb is None or td is None:
        auto_tb, auto_td = _choose_tiles(B, D, itemsize, target_bytes, n_tc)
        if td is None:
            td = auto_td
        if tb is None:
            tb = auto_tb
    tb = min(tb, B)
    td = min(td, D)

    # Block-shape legality: last two dims must be (sublane, 128)-multiples or full
    # extent.  td no longer has to divide D — the tail feature block is masked.
    assert td == D or td % 128 == 0, "td must equal D or be a multiple of 128"
    assert tb == B or tb % sub == 0, f"tb must equal B or be a multiple of {sub}"

    grid_i = pl.cdiv(B, tb)   # batch steps
    grid_j = pl.cdiv(D, td)   # feature stripes
    # Feature-major grid order: bias block index (0, j) is constant across all batch
    # steps of a stripe, so its (tiny, 1-sublane) DMA is elided except grid_j times.
    grid = (grid_j, grid_i)

    bias2d = bias1d.reshape(1, D)

    cost = pl.CostEstimate(
        flops=B * D,
        transcendentals=0,
        bytes_accessed=(2 * B * D + D) * itemsize,   # read x + bias, write out
    )

    cp_kwargs = dict(dimension_semantics=("parallel", "parallel"))
    if vmem_limit is not None:
        cp_kwargs["vmem_limit_bytes"] = int(vmem_limit)

    out2 = pl.pallas_call(
        _add_bias_kernel,
        out_shape=jax.ShapeDtypeStruct((B, D), x.dtype),
        grid_spec=pltpu.PrefetchScalarGridSpec(
            num_scalar_prefetch=0,
            grid=grid,
            in_specs=[
                pl.BlockSpec((tb, td), lambda j, i: (i, j)),   # activation tile
                pl.BlockSpec((1, td), lambda j, i: (0, j)),    # bias stripe (DMA elided over i)
            ],
            out_specs=pl.BlockSpec((tb, td), lambda j, i: (i, j)),
        ),
        compiler_params=pltpu.CompilerParams(**cp_kwargs),
        cost_estimate=cost,
        input_output_aliases={0: 0} if donate_x else {},
    )(x2, bias2d)

    return out2.reshape(orig_shape)


# ------------------------------------------------------------------------------ demo
if __name__ == "__main__":
    key = jax.random.PRNGKey(0)
    kx, kb, kx2, kb2, kx3, kb3 = jax.random.split(key, 6)

    # 1) Main Pallas path: lane-dense feature axis (multiple of 128), ragged batch.
    B, D = 520, 256
    x = jax.random.normal(kx, (B, D), dtype=jnp.float32)
    bias = jax.random.normal(kb, (D,), dtype=jnp.float32) * 0.1
    ref = x + bias[None, :]

    out = jax.block_until_ready(add_bias(x, bias, force_pallas=True))     # auto tiles
    assert out.shape == x.shape and out.dtype == x.dtype
    assert jnp.allclose(out, ref, atol=1e-6), "auto-tile mismatch vs reference"

    # 2) Explicit tiles: masked batch tail + feature split (bias DMA elided per stripe).
    out_t = jax.block_until_ready(add_bias(x, bias, tb=128, td=128, force_pallas=True))
    assert jnp.allclose(out_t, ref, atol=1e-6), "explicit-tile mismatch vs reference"

    # 3) Non-divisor feature tile (384 % 256 != 0): masked tail blocks on BOTH axes.
    x3 = jax.random.normal(kx3, (264, 384), dtype=jnp.float32)
    b3 = jax.random.normal(kb3, (384,), dtype=jnp.float32) * 0.1
    out3 = jax.block_until_ready(add_bias(x3, b3, tb=128, td=256, force_pallas=True))
    assert jnp.allclose(out3, x3 + b3[None, :], atol=1e-6), "non-divisor-td mismatch"

    # 4) bf16 with leading dims (bias broadcasts over all leading axes, like the module).
    x4 = jax.random.normal(kx2, (4, 16, 256), dtype=jnp.bfloat16)
    b4 = (jax.random.normal(kb2, (256,), dtype=jnp.float32) * 0.1).astype(jnp.bfloat16)
    out4 = jax.block_until_ready(add_bias(x4, b4, force_pallas=True))
    assert out4.shape == x4.shape and out4.dtype == x4.dtype
    assert jnp.allclose(out4.astype(jnp.float32), (x4 + b4).astype(jnp.float32),
                        atol=1e-2), "bf16 leading-dims mismatch"

    # 5) Aliased output (x is dead after this) with a ragged (masked tail) batch grid.
    out_d = jax.block_until_ready(add_bias(x, bias, donate_x=True, force_pallas=True))
    assert jnp.allclose(out_d, ref, atol=1e-6), "donate_x mismatch vs reference"

    # 6) Tiny Gaussian-policy-head shape (hidden=32 < 128 lanes): wrapper bypasses the
    #    kernel and uses a plain XLA add (same semantics, no masked-store penalty).
    xs = jax.random.normal(kx, (8, 32), dtype=jnp.float32)
    bs = jax.random.normal(kb, (32,), dtype=jnp.float32) * 0.1
    outs = jax.block_until_ready(add_bias(xs, bs))
    assert jnp.allclose(outs, xs + bs[None, :], atol=1e-6), "small-path mismatch"

    print("KERNEL_OK")
</pallas_src>

<mosaic_0001>
module attributes {stable_mosaic.version = 11 : i64} {
  func.func @_add_bias_kernel(%arg0: i32, %arg1: i32, %arg2: memref<520x256xf32, #tpu.memory_space<vmem>>, %arg3: memref<1x256xf32, #tpu.memory_space<vmem>>, %arg4: memref<520x256xf32, #tpu.memory_space<vmem>>) attributes {dimension_semantics = [#tpu.dimension_semantics<parallel>, #tpu.dimension_semantics<parallel>], iteration_bounds = array<i64: 1, 1>, scalar_prefetch = 0 : i64, scratch_operands = 0 : i64, tpu.core_type = #tpu.core_type<tc>, window_params = [{transform_indices = @transform_0, window_bounds = array<i64: 520, 256>}, {transform_indices = @transform_1, window_bounds = array<i64: 1, 256>}, {transform_indices = @transform_2, window_bounds = array<i64: 520, 256>}]} {
    %c0 = arith.constant 0 : index
    %c0_0 = arith.constant 0 : index
    %0 = vector.load %arg2[%c0, %c0_0] : memref<520x256xf32, #tpu.memory_space<vmem>>, vector<520x256xf32>
    %c0_1 = arith.constant 0 : index
    %c0_2 = arith.constant 0 : index
    %1 = vector.load %arg3[%c0_1, %c0_2] : memref<1x256xf32, #tpu.memory_space<vmem>>, vector<1x256xf32>
    %2 = vector.broadcast %1 : vector<1x256xf32> to vector<520x256xf32>
    %3 = arith.addf %0, %2 : vector<520x256xf32>
    %c0_3 = arith.constant 0 : index
    %c0_4 = arith.constant 0 : index
    %4 = vector.load %arg4[%c0_3, %c0_4] : memref<520x256xf32, #tpu.memory_space<vmem>>, vector<520x256xf32>
    tpu.vector_store %arg4[%c0_3, %c0_4], %3 {strides = array<i32>} : memref<520x256xf32, #tpu.memory_space<vmem>>, vector<520x256xf32>,
    return
  }
  func.func @transform_0(%arg0: i32, %arg1: i32) -> (i32, i32) {
    %c0_i32 = arith.constant 0 : i32
    return %arg1, %arg0 : i32, i32
  }
  func.func @transform_1(%arg0: i32, %arg1: i32) -> (i32, i32) {
    %c0_i32 = arith.constant 0 : i32
    %c0_i32_0 = arith.constant 0 : i32
    return %c0_i32, %arg0 : i32, i32
  }
  func.func @transform_2(%arg0: i32, %arg1: i32) -> (i32, i32) {
    %c0_i32 = arith.constant 0 : i32
    return %arg1, %arg0 : i32, i32
  }
}

</mosaic_0001>

<bundles_post_ra>
// kernel: tpu_custom_call.1
= control target key start
LH: loop header
LB: loop body
LE: loop exit
PB: predicated region body
PF: predicated region fallthrough
CT: control target
= control target key end

     0   :  { %7 = vsyncpa [#allocation3], 0  ;;  %s683_s0 = inlined_call_operand.hbm [shape: f32[520,256], index: 0, kind: input, shape index: {}]   ;;  %s684_s1 = inlined_call_operand.vmem [shape: f32[1,256], index: 1, kind: input, shape index: {}]   ;;  %s685_s2 = inlined_call_operand.hbm [shape: f32[520,256], index: 2, kind: output, shape index: {}]  }
   0x1   :  { %8 = vsyncpa [#allocation4], 0  ;;  %s497_s9 = smov [#allocation2]   ;;  %s449_s13 = scalar_lea.hbm %s683_s0, 16640 }
   0x2   :  { %s14_s10 = sshll.u32 %s497_s9, 4  ;;  %p450_p0 = scmp.ne.s32.totalorder %s683_s0, %s449_s13  ;;  %s15_s10 = int_to_ptr.vmem [resolvable:$true] %s14_s10 }
   0x3   :  { %p453_p1 = scmp.lt.u32.totalorder %s449_s13, %s683_s0 }
   0x5   :  { %p455_p2 = pnand %p453_p1, %p450_p0 }
   0x7   :  { %458 = shalt.err (!%p455_p2)
}
   0x8   :  { %s459_s18 = scalar_lea.vmem %s15_s10, 16640  ;;  %p464_p4 = scmp.lt.s32.totalorder %s15_s10, %s15_s10 }
   0x9   :  { %p460_p3 = scmp.ne.s32.totalorder %s15_s10, %s459_s18  ;;  %p465_p5 = scmp.lt.s32.totalorder %s459_s18, %s459_s18 }
   0xb   :  { %p466_p6 = por %p465_p5, %p464_p4 }
   0xd   :  { %p467_p7 = pnand %p466_p6, %p460_p3 }
   0xf   :  { %470 = shalt.err (!%p467_p7)
}
  0x10   :  { %s498_s19 = smov 256   ;;  %s499_s20 = smov 16  }
  0x11   :  { %20 = dma.hbm_to_vmem [thread:$0]  %s683_s0, 16640, %s15_s10, [#allocation3], %s498_s19, %s498_s19, %s499_s20  }
  0x12   :  { %493 = dma.done.wait [#allocation3], 16640  }
  0x13   :  { %494 = vsyncadd [#allocation3], 4294950656  ;;  %v158_v0 = vlaneseq  ;;  %v26_v4 = vld [vmem:[#allocation2] sm:$0xff]  ;;  %v27_v6 = vld [vmem:[#allocation2 + $0x8] sm:$0xff]  ;;  %s500_s0 = smov [#allocation5]  }
  0x14   :  { %v156_v5 = vld [vmem:[%s684_s1] sm:$0x3]  ;;  %v28_v9 = vld [vmem:[#allocation2 + $0x10] sm:$0xff]  ;;  %v29_v10 = vld [vmem:[#allocation2 + $0x18] sm:$0xff]  ;;  %s433_s1 = sshll.u32 %s500_s0, 4  ;;  %s434_s1 = int_to_ptr.vmem [resolvable:$true] %s433_s1 }
  0x15   :  { %v159_v1 = vshrl.u32 %v158_v0, 7  ;;  %v30_v11 = vld [vmem:[#allocation2 + $0x20] sm:$0xff]  ;;  %v31_v12 = vld [vmem:[#allocation2 + $0x28] sm:$0xff]  ;;  %v32_v13 = vld [vmem:[#allocation2 + $0x30] sm:$0xff]  ;;  %s471_s25 = scalar_lea.vmem %s434_s1, 16640  ;;  %p476_p9 = scmp.lt.s32.totalorder %s434_s1, %s434_s1 }
  0x16   :  { %v33_v14 = vld [vmem:[#allocation2 + $0x38] sm:$0xff]  ;;  %v34_v19 = vld [vmem:[#allocation2 + $0x40] sm:$0xff]  ;;  %v35_v20 = vld [vmem:[#allocation2 + $0x48] sm:$0xff]  ;;  %p472_p8 = scmp.ne.s32.totalorder %s434_s1, %s471_s25  ;;  %p477_p10 = scmp.lt.s32.totalorder %s471_s25, %s471_s25 }
  0x17   :  { %v160_v2 = vsub.s32 0, %v159_v1  ;;  %v164_v3 = vsub.s32 1, %v159_v1  ;;  %v36_v21 = vld [vmem:[#allocation2 + $0x50] sm:$0xff]  ;;  %v37_v26 = vld [vmem:[#allocation2 + $0x58] sm:$0xff]  ;;  %v38_v27 = vld [vmem:[#allocation2 + $0x60] sm:$0xff] }
  0x18   :  { %v39_v28 = vld [vmem:[#allocation2 + $0x68] sm:$0xff]  ;;  %v40_v33 = vld [vmem:[#allocation2 + $0x70] sm:$0xff]  ;;  %v41_v34 = vld [vmem:[#allocation2 + $0x78] sm:$0xff]  ;;  %p478_p11 = por %p477_p10, %p476_p9 }
  0x19   :  { %v534_v7 = vrot.slane %v156_v5, %v160_v2  ;;  %v536_v8 = vrot.slane %v156_v5, %v164_v3  ;;  %v42_v35 = vld [vmem:[#allocation2 + $0x80] sm:$0xff]  ;;  %v43_v40 = vld [vmem:[#allocation2 + $0x88] sm:$0xff]  ;;  %v44_v41 = vld [vmem:[#allocation2 + $0x90] sm:$0xff] }
  0x1a   :  { %v45_v42 = vld [vmem:[#allocation2 + $0x98] sm:$0xff]  ;;  %v46_v47 = vld [vmem:[#allocation2 + $0xa0] sm:$0xff]  ;;  %v47_v48 = vld [vmem:[#allocation2 + $0xa8] sm:$0xff]  ;;  %p479_p12 = pnand %p478_p11, %p472_p8 }
  0x1b   :  { %v168_v15 = vadd.f32 %v534_v7, %v26_v4  ;;  %v169_v16 = vadd.f32 %v536_v8, %v27_v6  ;;  %v170_v17 = vadd.f32 %v534_v7, %v28_v9  ;;  %v171_v18 = vadd.f32 %v536_v8, %v29_v10  ;;  %v48_v49 = vld [vmem:[#allocation2 + $0xb0] sm:$0xff]  ;;  %v49_v53 = vld [vmem:[#allocation2 + $0xb8] sm:$0xff]  ;;  %v50_v54 = vld [vmem:[#allocation2 + $0xc0] sm:$0xff] }
  0x1c   :  { %v172_v22 = vadd.f32 %v534_v7, %v30_v11  ;;  %v173_v23 = vadd.f32 %v536_v8, %v31_v12  ;;  %v174_v24 = vadd.f32 %v534_v7, %v32_v13  ;;  %v175_v25 = vadd.f32 %v536_v8, %v33_v14  ;;  %v51_v55 = vld [vmem:[#allocation2 + $0xc8] sm:$0xff]  ;;  %v52_v59 = vld [vmem:[#allocation2 + $0xd0] sm:$0xff]  ;;  %v53_v60 = vld [vmem:[#allocation2 + $0xd8] sm:$0xff] }
  0x1d   :  { %298 = vst [vmem:[#allocation5] sm:$0xff] %v168_v15  ;;  %299 = vst [vmem:[#allocation5 + $0x8] sm:$0xff] %v169_v16  ;;  %v176_v29 = vadd.f32 %v534_v7, %v34_v19  ;;  %v177_v30 = vadd.f32 %v536_v8, %v35_v20  ;;  %v178_v31 = vadd.f32 %v534_v7, %v36_v21  ;;  %v54_v61 = vld [vmem:[#allocation2 + $0xe0] sm:$0xff]  ;;  %v55_v1 = vld [vmem:[#allocation2 + $0xe8] sm:$0xff] }
  0x1e   :  { %300 = vst [vmem:[#allocation5 + $0x10] sm:$0xff] %v170_v17  ;;  %301 = vst [vmem:[#allocation5 + $0x18] sm:$0xff] %v171_v18  ;;  %v179_v32 = vadd.f32 %v536_v8, %v37_v26  ;;  %v180_v36 = vadd.f32 %v534_v7, %v38_v27  ;;  %v181_v37 = vadd.f32 %v536_v8, %v39_v28  ;;  %v56_v2 = vld [vmem:[#allocation2 + $0xf0] sm:$0xff]  ;;  %v57_v3 = vld [vmem:[#allocation2 + $0xf8] sm:$0xff] }
  0x1f   :  { %302 = vst [vmem:[#allocation5 + $0x20] sm:$0xff] %v172_v22  ;;  %303 = vst [vmem:[#allocation5 + $0x28] sm:$0xff] %v173_v23  ;;  %v182_v38 = vadd.f32 %v534_v7, %v40_v33  ;;  %v183_v39 = vadd.f32 %v536_v8, %v41_v34  ;;  %v184_v43 = vadd.f32 %v534_v7, %v42_v35  ;;  %v58_v9 = vld [vmem:[#allocation2 + $0x100] sm:$0xff]  ;;  %v59_v10 = vld [vmem:[#allocation2 + $0x108] sm:$0xff] }
  0x20   :  { %304 = vst [vmem:[#allocation5 + $0x30] sm:$0xff] %v174_v24  ;;  %305 = vst [vmem:[#allocation5 + $0x38] sm:$0xff] %v175_v25  ;;  %v185_v44 = vadd.f32 %v536_v8, %v43_v40  ;;  %v186_v45 = vadd.f32 %v534_v7, %v44_v41  ;;  %v187_v46 = vadd.f32 %v536_v8, %v45_v42  ;;  %v60_v11 = vld [vmem:[#allocation2 + $0x110] sm:$0xff]  ;;  %v61_v15 = vld [vmem:[#allocation2 + $0x118] sm:$0xff] }
  0x21   :  { %306 = vst [vmem:[#allocation5 + $0x40] sm:$0xff] %v176_v29  ;;  %307 = vst [vmem:[#allocation5 + $0x48] sm:$0xff] %v177_v30  ;;  %v188_v50 = vadd.f32 %v534_v7, %v46_v47  ;;  %v189_v51 = vadd.f32 %v536_v8, %v47_v48  ;;  %v190_v52 = vadd.f32 %v534_v7, %v48_v49  ;;  %v62_v16 = vld [vmem:[#allocation2 + $0x120] sm:$0xff]  ;;  %v63_v17 = vld [vmem:[#allocation2 + $0x128] sm:$0xff] }
  0x22   :  { %308 = vst [vmem:[#allocation5 + $0x50] sm:$0xff] %v178_v31  ;;  %309 = vst [vmem:[#allocation5 + $0x58] sm:$0xff] %v179_v32  ;;  %v191_v56 = vadd.f32 %v536_v8, %v49_v53  ;;  %v192_v57 = vadd.f32 %v534_v7, %v50_v54  ;;  %v193_v58 = vadd.f32 %v536_v8, %v51_v55  ;;  %v64_v21 = vld [vmem:[#allocation2 + $0x130] sm:$0xff]  ;;  %v65_v22 = vld [vmem:[#allocation2 + $0x138] sm:$0xff] }
  0x23   :  { %310 = vst [vmem:[#allocation5 + $0x60] sm:$0xff] %v180_v36  ;;  %311 = vst [vmem:[#allocation5 + $0x68] sm:$0xff] %v181_v37  ;;  %v194_v62 = vadd.f32 %v534_v7, %v52_v59  ;;  %v195_v63 = vadd.f32 %v536_v8, %v53_v60  ;;  %v196_v0 = vadd.f32 %v534_v7, %v54_v61  ;;  %v66_v23 = vld [vmem:[#allocation2 + $0x140] sm:$0xff]  ;;  %v67_v27 = vld [vmem:[#allocation2 + $0x148] sm:$0xff] }
  0x24   :  { %312 = vst [vmem:[#allocation5 + $0x70] sm:$0xff] %v182_v38  ;;  %313 = vst [vmem:[#allocation5 + $0x78] sm:$0xff] %v183_v39  ;;  %v197_v4 = vadd.f32 %v536_v8, %v55_v1  ;;  %v198_v5 = vadd.f32 %v534_v7, %v56_v2  ;;  %v199_v6 = vadd.f32 %v536_v8, %v57_v3  ;;  %v68_v28 = vld [vmem:[#allocation2 + $0x150] sm:$0xff]  ;;  %v69_v29 = vld [vmem:[#allocation2 + $0x158] sm:$0xff] }
  0x25   :  { %314 = vst [vmem:[#allocation5 + $0x80] sm:$0xff] %v184_v43  ;;  %315 = vst [vmem:[#allocation5 + $0x88] sm:$0xff] %v185_v44  ;;  %v200_v12 = vadd.f32 %v534_v7, %v58_v9  ;;  %v201_v13 = vadd.f32 %v536_v8, %v59_v10  ;;  %v202_v14 = vadd.f32 %v534_v7, %v60_v11  ;;  %v70_v33 = vld [vmem:[#allocation2 + $0x160] sm:$0xff]  ;;  %v71_v34 = vld [vmem:[#allocation2 + $0x168] sm:$0xff] }
  0x26   :  { %316 = vst [vmem:[#allocation5 + $0x90] sm:$0xff] %v186_v45  ;;  %317 = vst [vmem:[#allocation5 + $0x98] sm:$0xff] %v187_v46  ;;  %v203_v18 = vadd.f32 %v536_v8, %v61_v15  ;;  %v204_v19 = vadd.f32 %v534_v7, %v62_v16  ;;  %v205_v20 = vadd.f32 %v536_v8, %v63_v17  ;;  %v72_v35 = vld [vmem:[#allocation2 + $0x170] sm:$0xff]  ;;  %v73_v39 = vld [vmem:[#allocation2 + $0x178] sm:$0xff] }
  0x27   :  { %318 = vst [vmem:[#allocation5 + $0xa0] sm:$0xff] %v188_v50  ;;  %319 = vst [vmem:[#allocation5 + $0xa8] sm:$0xff] %v189_v51  ;;  %v206_v24 = vadd.f32 %v534_v7, %v64_v21  ;;  %v207_v25 = vadd.f32 %v536_v8, %v65_v22  ;;  %v208_v26 = vadd.f32 %v534_v7, %v66_v23  ;;  %v74_v40 = vld [vmem:[#allocation2 + $0x180] sm:$0xff]  ;;  %v75_v41 = vld [vmem:[#allocation2 + $0x188] sm:$0xff] }
  0x28   :  { %320 = vst [vmem:[#allocation5 + $0xb0] sm:$0xff] %v190_v52  ;;  %321 = vst [vmem:[#allocation5 + $0xb8] sm:$0xff] %v191_v56  ;;  %v209_v30 = vadd.f32 %v536_v8, %v67_v27  ;;  %v210_v31 = vadd.f32 %v534_v7, %v68_v28  ;;  %v211_v32 = vadd.f32 %v536_v8, %v69_v29  ;;  %v76_v45 = vld [vmem:[#allocation2 + $0x190] sm:$0xff]  ;;  %v77_v46 = vld [vmem:[#allocation2 + $0x198] sm:$0xff] }
  0x29   :  { %322 = vst [vmem:[#allocation5 + $0xc0] sm:$0xff] %v192_v57  ;;  %323 = vst [vmem:[#allocation5 + $0xc8] sm:$0xff] %v193_v58  ;;  %v212_v36 = vadd.f32 %v534_v7, %v70_v33  ;;  %v213_v37 = vadd.f32 %v536_v8, %v71_v34  ;;  %v214_v38 = vadd.f32 %v534_v7, %v72_v35  ;;  %v78_v47 = vld [vmem:[#allocation2 + $0x1a0] sm:$0xff]  ;;  %v79_v51 = vld [vmem:[#allocation2 + $0x1a8] sm:$0xff] }
  0x2a   :  { %324 = vst [vmem:[#allocation5 + $0xd0] sm:$0xff] %v194_v62  ;;  %325 = vst [vmem:[#allocation5 + $0xd8] sm:$0xff] %v195_v63  ;;  %v215_v42 = vadd.f32 %v536_v8, %v73_v39  ;;  %v216_v43 = vadd.f32 %v534_v7, %v74_v40  ;;  %v217_v44 = vadd.f32 %v536_v8, %v75_v41  ;;  %v80_v52 = vld [vmem:[#allocation2 + $0x1b0] sm:$0xff]  ;;  %v81_v53 = vld [vmem:[#allocation2 + $0x1b8] sm:$0xff] }
  0x2b   :  { %326 = vst [vmem:[#allocation5 + $0xe0] sm:$0xff] %v196_v0  ;;  %327 = vst [vmem:[#allocation5 + $0xe8] sm:$0xff] %v197_v4  ;;  %v218_v48 = vadd.f32 %v534_v7, %v76_v45  ;;  %v219_v49 = vadd.f32 %v536_v8, %v77_v46  ;;  %v220_v50 = vadd.f32 %v534_v7, %v78_v47  ;;  %v82_v57 = vld [vmem:[#allocation2 + $0x1c0] sm:$0xff]  ;;  %v83_v58 = vld [vmem:[#allocation2 + $0x1c8] sm:$0xff] }
  0x2c   :  { %328 = vst [vmem:[#allocation5 + $0xf0] sm:$0xff] %v198_v5  ;;  %329 = vst [vmem:[#allocation5 + $0xf8] sm:$0xff] %v199_v6  ;;  %v221_v54 = vadd.f32 %v536_v8, %v79_v51  ;;  %v222_v55 = vadd.f32 %v534_v7, %v80_v52  ;;  %v223_v56 = vadd.f32 %v536_v8, %v81_v53  ;;  %v84_v59 = vld [vmem:[#allocation2 + $0x1d0] sm:$0xff]  ;;  %v85_v63 = vld [vmem:[#allocation2 + $0x1d8] sm:$0xff] }
  0x2d   :  { %330 = vst [vmem:[#allocation5 + $0x100] sm:$0xff] %v200_v12  ;;  %331 = vst [vmem:[#allocation5 + $0x108] sm:$0xff] %v201_v13  ;;  %v224_v60 = vadd.f32 %v534_v7, %v82_v57  ;;  %v225_v61 = vadd.f32 %v536_v8, %v83_v58  ;;  %v226_v62 = vadd.f32 %v534_v7, %v84_v59  ;;  %v86_v0 = vld [vmem:[#allocation2 + $0x1e0] sm:$0xff]  ;;  %v87_v1 = vld [vmem:[#allocation2 + $0x1e8] sm:$0xff] }
  0x2e   :  { %332 = vst [vmem:[#allocation5 + $0x110] sm:$0xff] %v202_v14  ;;  %333 = vst [vmem:[#allocation5 + $0x118] sm:$0xff] %v203_v18  ;;  %v227_v2 = vadd.f32 %v536_v8, %v85_v63  ;;  %v228_v3 = vadd.f32 %v534_v7, %v86_v0  ;;  %v229_v4 = vadd.f32 %v536_v8, %v87_v1  ;;  %v88_v5 = vld [vmem:[#allocation2 + $0x1f0] sm:$0xff]  ;;  %v89_v6 = vld [vmem:[#allocation2 + $0x1f8] sm:$0xff] }
  0x2f   :  { %334 = vst [vmem:[#allocation5 + $0x120] sm:$0xff] %v204_v19  ;;  %335 = vst [vmem:[#allocation5 + $0x128] sm:$0xff] %v205_v20  ;;  %v90_v9 = vld [vmem:[#allocation2 + $0x200] sm:$0xff]  ;;  %v230_v10 = vadd.f32 %v534_v7, %v88_v5  ;;  %v231_v11 = vadd.f32 %v536_v8, %v89_v6  ;;  %v91_v13 = vld [vmem:[#allocation2 + $0x208] sm:$0xff] }
  0x30   :  { %336 = vst [vmem:[#allocation5 + $0x130] sm:$0xff] %v206_v24  ;;  %337 = vst [vmem:[#allocation5 + $0x138] sm:$0xff] %v207_v25  ;;  %v232_v12 = vadd.f32 %v534_v7, %v90_v9  ;;  %v92_v14 = vld [vmem:[#allocation2 + $0x210] sm:$0xff]  ;;  %v93_v15 = vld [vmem:[#allocation2 + $0x218] sm:$0xff]  ;;  %v233_v16 = vadd.f32 %v536_v8, %v91_v13 }
  0x31   :  { %338 = vst [vmem:[#allocation5 + $0x140] sm:$0xff] %v208_v26  ;;  %339 = vst [vmem:[#allocation5 + $0x148] sm:$0xff] %v209_v30  ;;  %v234_v17 = vadd.f32 %v534_v7, %v92_v14  ;;  %v235_v18 = vadd.f32 %v536_v8, %v93_v15  ;;  %v94_v19 = vld [vmem:[#allocation2 + $0x220] sm:$0xff]  ;;  %v95_v20 = vld [vmem:[#allocation2 + $0x228] sm:$0xff] }
  0x32   :  { %340 = vst [vmem:[#allocation5 + $0x150] sm:$0xff] %v210_v31  ;;  %341 = vst [vmem:[#allocation5 + $0x158] sm:$0xff] %v211_v32  ;;  %v96_v21 = vld [vmem:[#allocation2 + $0x230] sm:$0xff]  ;;  %v236_v22 = vadd.f32 %v534_v7, %v94_v19  ;;  %v237_v23 = vadd.f32 %v536_v8, %v95_v20  ;;  %v97_v25 = vld [vmem:[#allocation2 + $0x238] sm:$0xff] }
  0x33   :  { %342 = vst [vmem:[#allocation5 + $0x160] sm:$0xff] %v212_v36  ;;  %343 = vst [vmem:[#allocation5 + $0x168] sm:$0xff] %v213_v37  ;;  %v238_v24 = vadd.f32 %v534_v7, %v96_v21  ;;  %v98_v26 = vld [vmem:[#allocation2 + $0x240] sm:$0xff]  ;;  %v99_v27 = vld [vmem:[#allocation2 + $0x248] sm:$0xff]  ;;  %v239_v28 = vadd.f32 %v536_v8, %v97_v25 }
  0x34   :  { %344 = vst [vmem:[#allocation5 + $0x170] sm:$0xff] %v214_v38  ;;  %345 = vst [vmem:[#allocation5 + $0x178] sm:$0xff] %v215_v42  ;;  %v240_v29 = vadd.f32 %v534_v7, %v98_v26  ;;  %v241_v30 = vadd.f32 %v536_v8, %v99_v27  ;;  %v100_v31 = vld [vmem:[#allocation2 + $0x250] sm:$0xff]  ;;  %v101_v32 = vld [vmem:[#allocation2 + $0x258] sm:$0xff] }
  0x35   :  { %346 = vst [vmem:[#allocation5 + $0x180] sm:$0xff] %v216_v43  ;;  %347 = vst [vmem:[#allocation5 + $0x188] sm:$0xff] %v217_v44  ;;  %v102_v33 = vld [vmem:[#allocation2 + $0x260] sm:$0xff]  ;;  %v242_v34 = vadd.f32 %v534_v7, %v100_v31  ;;  %v243_v35 = vadd.f32 %v536_v8, %v101_v32  ;;  %v103_v37 = vld [vmem:[#allocation2 + $0x268] sm:$0xff] }
  0x36   :  { %348 = vst [vmem:[#allocation5 + $0x190] sm:$0xff] %v218_v48  ;;  %349 = vst [vmem:[#allocation5 + $0x198] sm:$0xff] %v219_v49  ;;  %v244_v36 = vadd.f32 %v534_v7, %v102_v33  ;;  %v104_v38 = vld [vmem:[#allocation2 + $0x270] sm:$0xff]  ;;  %v105_v39 = vld [vmem:[#allocation2 + $0x278] sm:$0xff]  ;;  %v245_v40 = vadd.f32 %v536_v8, %v103_v37 }
  0x37   :  { %350 = vst [vmem:[#allocation5 + $0x1a0] sm:$0xff] %v220_v50  ;;  %351 = vst [vmem:[#allocation5 + $0x1a8] sm:$0xff] %v221_v54  ;;  %v246_v41 = vadd.f32 %v534_v7, %v104_v38  ;;  %v247_v42 = vadd.f32 %v536_v8, %v105_v39  ;;  %v106_v43 = vld [vmem:[#allocation2 + $0x280] sm:$0xff]  ;;  %v107_v44 = vld [vmem:[#allocation2 + $0x288] sm:$0xff] }
  0x38   :  { %352 = vst [vmem:[#allocation5 + $0x1b0] sm:$0xff] %v222_v55  ;;  %353 = vst [vmem:[#allocation5 + $0x1b8] sm:$0xff] %v223_v56  ;;  %v108_v45 = vld [vmem:[#allocation2 + $0x290] sm:$0xff]  ;;  %v248_v46 = vadd.f32 %v534_v7, %v106_v43  ;;  %v249_v47 = vadd.f32 %v536_v8, %v107_v44  ;;  %v109_v49 = vld [vmem:[#allocation2 + $0x298] sm:$0xff] }
  0x39   :  { %354 = vst [vmem:[#allocation5 + $0x1c0] sm:$0xff] %v224_v60  ;;  %355 = vst [vmem:[#allocation5 + $0x1c8] sm:$0xff] %v225_v61  ;;  %v250_v48 = vadd.f32 %v534_v7, %v108_v45  ;;  %v110_v50 = vld [vmem:[#allocation2 + $0x2a0] sm:$0xff]  ;;  %v111_v51 = vld [vmem:[#allocation2 + $0x2a8] sm:$0xff]  ;;  %v251_v52 = vadd.f32 %v536_v8, %v109_v49 }
  0x3a   :  { %356 = vst [vmem:[#allocation5 + $0x1d0] sm:$0xff] %v226_v62  ;;  %357 = vst [vmem:[#allocation5 + $0x1d8] sm:$0xff] %v227_v2  ;;  %v252_v53 = vadd.f32 %v534_v7, %v110_v50  ;;  %v253_v54 = vadd.f32 %v536_v8, %v111_v51  ;;  %v112_v55 = vld [vmem:[#allocation2 + $0x2b0] sm:$0xff]  ;;  %v113_v56 = vld [vmem:[#allocation2 + $0x2b8] sm:$0xff] }
  0x3b   :  { %358 = vst [vmem:[#allocation5 + $0x1e0] sm:$0xff] %v228_v3  ;;  %359 = vst [vmem:[#allocation5 + $0x1e8] sm:$0xff] %v229_v4  ;;  %v114_v57 = vld [vmem:[#allocation2 + $0x2c0] sm:$0xff]  ;;  %v254_v58 = vadd.f32 %v534_v7, %v112_v55  ;;  %v255_v59 = vadd.f32 %v536_v8, %v113_v56  ;;  %v115_v61 = vld [vmem:[#allocation2 + $0x2c8] sm:$0xff] }
  0x3c   :  { %360 = vst [vmem:[#allocation5 + $0x1f0] sm:$0xff] %v230_v10  ;;  %361 = vst [vmem:[#allocation5 + $0x1f8] sm:$0xff] %v231_v11  ;;  %v256_v60 = vadd.f32 %v534_v7, %v114_v57  ;;  %v116_v62 = vld [vmem:[#allocation2 + $0x2d0] sm:$0xff]  ;;  %v117_v63 = vld [vmem:[#allocation2 + $0x2d8] sm:$0xff]  ;;  %v257_v0 = vadd.f32 %v536_v8, %v115_v61 }
  0x3d   :  { %362 = vst [vmem:[#allocation5 + $0x200] sm:$0xff] %v232_v12  ;;  %363 = vst [vmem:[#allocation5 + $0x208] sm:$0xff] %v233_v16  ;;  %v258_v1 = vadd.f32 %v534_v7, %v116_v62  ;;  %v259_v2 = vadd.f32 %v536_v8, %v117_v63  ;;  %v118_v3 = vld [vmem:[#allocation2 + $0x2e0] sm:$0xff]  ;;  %v119_v4 = vld [vmem:[#allocation2 + $0x2e8] sm:$0xff] }
  0x3e   :  { %364 = vst [vmem:[#allocation5 + $0x210] sm:$0xff] %v234_v17  ;;  %365 = vst [vmem:[#allocation5 + $0x218] sm:$0xff] %v235_v18  ;;  %v120_v5 = vld [vmem:[#allocation2 + $0x2f0] sm:$0xff]  ;;  %v260_v6 = vadd.f32 %v534_v7, %v118_v3  ;;  %v261_v9 = vadd.f32 %v536_v8, %v119_v4  ;;  %v121_v11 = vld [vmem:[#allocation2 + $0x2f8] sm:$0xff] }
  0x3f   :  { %366 = vst [vmem:[#allocation5 + $0x220] sm:$0xff] %v236_v22  ;;  %367 = vst [vmem:[#allocation5 + $0x228] sm:$0xff] %v237_v23  ;;  %v262_v10 = vadd.f32 %v534_v7, %v120_v5  ;;  %v122_v12 = vld [vmem:[#allocation2 + $0x300] sm:$0xff]  ;;  %v123_v13 = vld [vmem:[#allocation2 + $0x308] sm:$0xff]  ;;  %v263_v14 = vadd.f32 %v536_v8, %v121_v11 }
  0x40   :  { %368 = vst [vmem:[#allocation5 + $0x230] sm:$0xff] %v238_v24  ;;  %369 = vst [vmem:[#allocation5 + $0x238] sm:$0xff] %v239_v28  ;;  %v264_v15 = vadd.f32 %v534_v7, %v122_v12  ;;  %v265_v16 = vadd.f32 %v536_v8, %v123_v13  ;;  %v124_v17 = vld [vmem:[#allocation2 + $0x310] sm:$0xff]  ;;  %v125_v18 = vld [vmem:[#allocation2 + $0x318] sm:$0xff] }
  0x41   :  { %370 = vst [vmem:[#allocation5 + $0x240] sm:$0xff] %v240_v29  ;;  %371 = vst [vmem:[#allocation5 + $0x248] sm:$0xff] %v241_v30  ;;  %v126_v19 = vld [vmem:[#allocation2 + $0x320] sm:$0xff]  ;;  %v266_v20 = vadd.f32 %v534_v7, %v124_v17  ;;  %v267_v21 = vadd.f32 %v536_v8, %v125_v18  ;;  %v127_v23 = vld [vmem:[#allocation2 + $0x328] sm:$0xff] }
  0x42   :  { %372 = vst [vmem:[#allocation5 + $0x250] sm:$0xff] %v242_v34  ;;  %373 = vst [vmem:[#allocation5 + $0x258] sm:$0xff] %v243_v35  ;;  %v268_v22 = vadd.f32 %v534_v7, %v126_v19  ;;  %v128_v24 = vld [vmem:[#allocation2 + $0x330] sm:$0xff]  ;;  %v129_v25 = vld [vmem:[#allocation2 + $0x338] sm:$0xff]  ;;  %v269_v26 = vadd.f32 %v536_v8, %v127_v23 }
  0x43   :  { %374 = vst [vmem:[#allocation5 + $0x260] sm:$0xff] %v244_v36  ;;  %375 = vst [vmem:[#allocation5 + $0x268] sm:$0xff] %v245_v40  ;;  %v270_v27 = vadd.f32 %v534_v7, %v128_v24  ;;  %v271_v28 = vadd.f32 %v536_v8, %v129_v25  ;;  %v130_v29 = vld [vmem:[#allocation2 + $0x340] sm:$0xff]  ;;  %v131_v30 = vld [vmem:[#allocation2 + $0x348] sm:$0xff] }
  0x44   :  { %376 = vst [vmem:[#allocation5 + $0x270] sm:$0xff] %v246_v41  ;;  %377 = vst [vmem:[#allocation5 + $0x278] sm:$0xff] %v247_v42  ;;  %v132_v31 = vld [vmem:[#allocation2 + $0x350] sm:$0xff]  ;;  %v272_v32 = vadd.f32 %v534_v7, %v130_v29  ;;  %v273_v33 = vadd.f32 %v536_v8, %v131_v30  ;;  %v133_v35 = vld [vmem:[#allocation2 + $0x358] sm:$0xff] }
  0x45   :  { %378 = vst [vmem:[#allocation5 + $0x280] sm:$0xff] %v248_v46  ;;  %379 = vst [vmem:[#allocation5 + $0x288] sm:$0xff] %v249_v47  ;;  %v274_v34 = vadd.f32 %v534_v7, %v132_v31  ;;  %v134_v36 = vld [vmem:[#allocation2 + $0x360] sm:$0xff]  ;;  %v135_v37 = vld [vmem:[#allocation2 + $0x368] sm:$0xff]  ;;  %v275_v38 = vadd.f32 %v536_v8, %v133_v35 }
  0x46   :  { %380 = vst [vmem:[#allocation5 + $0x290] sm:$0xff] %v250_v48  ;;  %381 = vst [vmem:[#allocation5 + $0x298] sm:$0xff] %v251_v52  ;;  %v276_v39 = vadd.f32 %v534_v7, %v134_v36  ;;  %v277_v40 = vadd.f32 %v536_v8, %v135_v37  ;;  %v136_v41 = vld [vmem:[#allocation2 + $0x370] sm:$0xff]  ;;  %v137_v42 = vld [vmem:[#allocation2 + $0x378] sm:$0xff] }
  0x47   :  { %382 = vst [vmem:[#allocation5 + $0x2a0] sm:$0xff] %v252_v53  ;;  %383 = vst [vmem:[#allocation5 + $0x2a8] sm:$0xff] %v253_v54  ;;  %v138_v43 = vld [vmem:[#allocation2 + $0x380] sm:$0xff]  ;;  %v278_v44 = vadd.f32 %v534_v7, %v136_v41  ;;  %v279_v45 = vadd.f32 %v536_v8, %v137_v42  ;;  %v139_v47 = vld [vmem:[#allocation2 + $0x388] sm:$0xff] }
  0x48   :  { %384 = vst [vmem:[#allocation5 + $0x2b0] sm:$0xff] %v254_v58  ;;  %385 = vst [vmem:[#allocation5 + $0x2b8] sm:$0xff] %v255_v59  ;;  %v280_v46 = vadd.f32 %v534_v7, %v138_v43  ;;  %v140_v48 = vld [vmem:[#allocation2 + $0x390] sm:$0xff]  ;;  %v141_v49 = vld [vmem:[#allocation2 + $0x398] sm:$0xff]  ;;  %v281_v50 = vadd.f32 %v536_v8, %v139_v47 }
  0x49   :  { %386 = vst [vmem:[#allocation5 + $0x2c0] sm:$0xff] %v256_v60  ;;  %387 = vst [vmem:[#allocation5 + $0x2c8] sm:$0xff] %v257_v0  ;;  %v282_v51 = vadd.f32 %v534_v7, %v140_v48  ;;  %v283_v52 = vadd.f32 %v536_v8, %v141_v49  ;;  %v142_v53 = vld [vmem:[#allocation2 + $0x3a0] sm:$0xff]  ;;  %v143_v54 = vld [vmem:[#allocation2 + $0x3a8] sm:$0xff] }
  0x4a   :  { %388 = vst [vmem:[#allocation5 + $0x2d0] sm:$0xff] %v258_v1  ;;  %389 = vst [vmem:[#allocation5 + $0x2d8] sm:$0xff] %v259_v2  ;;  %v144_v55 = vld [vmem:[#allocation2 + $0x3b0] sm:$0xff]  ;;  %v284_v56 = vadd.f32 %v534_v7, %v142_v53  ;;  %v285_v57 = vadd.f32 %v536_v8, %v143_v54  ;;  %v145_v59 = vld [vmem:[#allocation2 + $0x3b8] sm:$0xff] }
  0x4b   :  { %390 = vst [vmem:[#allocation5 + $0x2e0] sm:$0xff] %v260_v6  ;;  %391 = vst [vmem:[#allocation5 + $0x2e8] sm:$0xff] %v261_v9  ;;  %v286_v58 = vadd.f32 %v534_v7, %v144_v55  ;;  %v146_v60 = vld [vmem:[#allocation2 + $0x3c0] sm:$0xff]  ;;  %v147_v61 = vld [vmem:[#allocation2 + $0x3c8] sm:$0xff]  ;;  %v287_v62 = vadd.f32 %v536_v8, %v145_v59 }
  0x4c   :  { %392 = vst [vmem:[#allocation5 + $0x2f0] sm:$0xff] %v262_v10  ;;  %393 = vst [vmem:[#allocation5 + $0x2f8] sm:$0xff] %v263_v14  ;;  %v288_v63 = vadd.f32 %v534_v7, %v146_v60  ;;  %v289_v0 = vadd.f32 %v536_v8, %v147_v61  ;;  %v148_v1 = vld [vmem:[#allocation2 + $0x3d0] sm:$0xff]  ;;  %v149_v2 = vld [vmem:[#allocation2 + $0x3d8] sm:$0xff] }
  0x4d   :  { %394 = vst [vmem:[#allocation5 + $0x300] sm:$0xff] %v264_v15  ;;  %395 = vst [vmem:[#allocation5 + $0x308] sm:$0xff] %v265_v16  ;;  %v150_v3 = vld [vmem:[#allocation2 + $0x3e0] sm:$0xff]  ;;  %v290_v4 = vadd.f32 %v534_v7, %v148_v1  ;;  %v291_v5 = vadd.f32 %v536_v8, %v149_v2  ;;  %v151_v9 = vld [vmem:[#allocation2 + $0x3e8] sm:$0xff] }
  0x4e   :  { %396 = vst [vmem:[#allocation5 + $0x310] sm:$0xff] %v266_v20  ;;  %397 = vst [vmem:[#allocation5 + $0x318] sm:$0xff] %v267_v21  ;;  %v292_v6 = vadd.f32 %v534_v7, %v150_v3  ;;  %v152_v10 = vld [vmem:[#allocation2 + $0x3f0] sm:$0xff]  ;;  %v153_v11 = vld [vmem:[#allocation2 + $0x3f8] sm:$0xff]  ;;  %v293_v12 = vadd.f32 %v536_v8, %v151_v9 }
  0x4f   :  { %398 = vst [vmem:[#allocation5 + $0x320] sm:$0xff] %v268_v22  ;;  %399 = vst [vmem:[#allocation5 + $0x328] sm:$0xff] %v269_v26  ;;  %v294_v13 = vadd.f32 %v534_v7, %v152_v10  ;;  %v295_v14 = vadd.f32 %v536_v8, %v153_v11  ;;  %v154_v15 = vld [vmem:[#allocation2 + $0x400] sm:$0xff]  ;;  %v155_v16 = vld [vmem:[#allocation2 + $0x408] sm:$0xff] }
  0x50   :  { %400 = vst [vmem:[#allocation5 + $0x330] sm:$0xff] %v270_v27  ;;  %401 = vst [vmem:[#allocation5 + $0x338] sm:$0xff] %v271_v28  ;;  %v296_v17 = vadd.f32 %v534_v7, %v154_v15  ;;  %v297_v18 = vadd.f32 %v536_v8, %v155_v16 }
  0x51   :  { %402 = vst [vmem:[#allocation5 + $0x340] sm:$0xff] %v272_v32  ;;  %403 = vst [vmem:[#allocation5 + $0x348] sm:$0xff] %v273_v33 }
  0x52   :  { %404 = vst [vmem:[#allocation5 + $0x350] sm:$0xff] %v274_v34  ;;  %405 = vst [vmem:[#allocation5 + $0x358] sm:$0xff] %v275_v38 }
  0x53   :  { %406 = vst [vmem:[#allocation5 + $0x360] sm:$0xff] %v276_v39  ;;  %407 = vst [vmem:[#allocation5 + $0x368] sm:$0xff] %v277_v40 }
  0x54   :  { %408 = vst [vmem:[#allocation5 + $0x370] sm:$0xff] %v278_v44  ;;  %409 = vst [vmem:[#allocation5 + $0x378] sm:$0xff] %v279_v45 }
  0x55   :  { %410 = vst [vmem:[#allocation5 + $0x380] sm:$0xff] %v280_v46  ;;  %411 = vst [vmem:[#allocation5 + $0x388] sm:$0xff] %v281_v50 }
  0x56   :  { %412 = vst [vmem:[#allocation5 + $0x390] sm:$0xff] %v282_v51  ;;  %413 = vst [vmem:[#allocation5 + $0x398] sm:$0xff] %v283_v52 }
  0x57   :  { %414 = vst [vmem:[#allocation5 + $0x3a0] sm:$0xff] %v284_v56  ;;  %415 = vst [vmem:[#allocation5 + $0x3a8] sm:$0xff] %v285_v57 }
  0x58   :  { %416 = vst [vmem:[#allocation5 + $0x3b0] sm:$0xff] %v286_v58  ;;  %417 = vst [vmem:[#allocation5 + $0x3b8] sm:$0xff] %v287_v62 }
  0x59   :  { %418 = vst [vmem:[#allocation5 + $0x3c0] sm:$0xff] %v288_v63  ;;  %419 = vst [vmem:[#allocation5 + $0x3c8] sm:$0xff] %v289_v0 }
  0x5a   :  { %420 = vst [vmem:[#allocation5 + $0x3d0] sm:$0xff] %v290_v4  ;;  %421 = vst [vmem:[#allocation5 + $0x3d8] sm:$0xff] %v291_v5 }
  0x5b   :  { %422 = vst [vmem:[#allocation5 + $0x3e0] sm:$0xff] %v292_v6  ;;  %423 = vst [vmem:[#allocation5 + $0x3e8] sm:$0xff] %v293_v12 }
  0x5c   :  { %424 = vst [vmem:[#allocation5 + $0x3f0] sm:$0xff] %v294_v13  ;;  %425 = vst [vmem:[#allocation5 + $0x3f8] sm:$0xff] %v295_v14 }
  0x5d   :  { %426 = vst [vmem:[#allocation5 + $0x400] sm:$0xff] %v296_v17  ;;  %427 = vst [vmem:[#allocation5 + $0x408] sm:$0xff] %v297_v18 }
  0x5e   :  { %482 = shalt.err (!%p479_p12)
}
  0x5f   :  { %s483_s28 = scalar_lea.hbm %s685_s2, 16640 }
  0x60   :  { %p484_p13 = scmp.ne.s32.totalorder %s685_s2, %s483_s28  ;;  %p487_p0 = scmp.lt.u32.totalorder %s483_s28, %s685_s2 }
  0x62   :  { %p489_p1 = pnand %p487_p0, %p484_p13 }
  0x64   :  { %492 = shalt.err (!%p489_p1)
}
  0x65   :  { %439 = dma.vmem_to_hbm [thread:$0]  %s434_s1, 16640, %s685_s2, [#allocation4], %s498_s19, %s498_s19, %s499_s20  }
  0x66   :  { %495 = dma.done.wait [#allocation4], 16640  }
  0x67   :  { %496 = vsyncadd [#allocation4], 4294950656 }
  0x68   :  { %443 = vsyncpa [#allocation3], 1 }
  0x69   :  { %444 = vsyncpa [#allocation4], 1 }

</bundles_post_ra>
